<compile_context>
chip_gen: v6e
topology: v6e:2x2x1
jax: 0.10.0
libtpu: 0.0.40
codegen_flags: <defaults>
</compile_context>

<pallas_src>
import jax
import jax.numpy as jnp
from jax.experimental import pallas as pl
from jax.experimental.pallas import tpu as pltpu


# ---------------------------------------------------------------------------
# Small-batch path (the literal SimpleModel shape: B=1, IN=10, OUT=1).
# ---------------------------------------------------------------------------
def _linear_small_kernel(b_ref, x_ref, w_ref, o_ref):
    # x_ref: (B, IN) VMEM, w_ref: (OUT=1, IN) VMEM (PyTorch layout),
    # b_ref: (OUT,) scalar in SMEM, o_ref: (B, OUT=1) VMEM.
    bias = b_ref[0]  # hoisted scalar read (cheap insurance if this body is ever looped)
    # Broadcast multiply (VPU) + lane reduce (XLU); no MXU fill/drain for a 10-elem dot.
    o_ref[...] = jnp.sum(x_ref[...] * w_ref[...], axis=-1, keepdims=True) + bias


def _linear_small(x, w, b):
    B, _ = x.shape
    OUT = w.shape[0]
    return pl.pallas_call(
        _linear_small_kernel,
        out_shape=jax.ShapeDtypeStruct((B, OUT), jnp.float32),
        in_specs=[
            pl.BlockSpec(memory_space=pltpu.MemorySpace.SMEM),  # bias scalar
            pl.BlockSpec(memory_space=pltpu.MemorySpace.VMEM),  # x (full array)
            pl.BlockSpec(memory_space=pltpu.MemorySpace.VMEM),  # weight (full array)
        ],
        out_specs=pl.BlockSpec(memory_space=pltpu.MemorySpace.VMEM),
    )(b, x, w)


# ---------------------------------------------------------------------------
# Batched lane-dense path: compute y^T of shape (OUT=1, B) so the batch sits
# on the lane axis (unmasked lane-dense stores) and IN on sublanes.
# ---------------------------------------------------------------------------
def _linear_batched_kernel(b_ref, xt_ref, wt_ref, ot_ref):
    # xt_ref: (IN, TB) VMEM tile, wt_ref: (IN, OUT=1) VMEM (resident),
    # b_ref: (OUT,) scalar in SMEM, ot_ref: (OUT=1, TB) VMEM (lane-dense).
    bias = b_ref[0]  # hoisted scalar read
    # VPU broadcast-multiply + sublane reduce over IN; full 128-lane utilization.
    ot_ref[...] = jnp.sum(xt_ref[...] * wt_ref[...], axis=0, keepdims=True) + bias


def _linear_batched(x, w, b, tb):
    B, IN = x.shape
    OUT = w.shape[0]
    # Wrapper-side layout plumbing only (review: lane-dense output is the big lever).
    x_t = x.T  # (IN, B)
    w_t = w.T  # (IN, OUT=1)
    y_t = pl.pallas_call(
        _linear_batched_kernel,
        out_shape=jax.ShapeDtypeStruct((OUT, B), jnp.float32),
        grid_spec=pltpu.PrefetchScalarGridSpec(
            num_scalar_prefetch=0,
            grid=(B // tb,),
            in_specs=[
                pl.BlockSpec(memory_space=pltpu.MemorySpace.SMEM),  # bias scalar
                pl.BlockSpec((IN, tb), lambda i: (0, i)),           # x^T batch tile
                pl.BlockSpec((IN, OUT), lambda i: (0, 0)),          # w^T (resident)
            ],
            out_specs=pl.BlockSpec((OUT, tb), lambda i: (0, i)),    # y^T lane-dense
        ),
        compiler_params=pltpu.CompilerParams(
            # Batch axis is independent -> megacore split on v7x (no-op on v5e/v6e).
            dimension_semantics=("parallel",),
            # Explicit, conservative VMEM cap; tiles here are tiny and this fits
            # v7x's 64 MiB physical VMEM as well as v5e/v6e.
            vmem_limit_bytes=32 * 1024 * 1024,
        ),
    )(b, x_t, w_t)
    return y_t.T  # (B, OUT)


def simple_model_forward(x, w, b):
    """x: (B, IN) f32, w: (OUT, IN) f32 (PyTorch nn.Linear layout), b: (OUT,) f32 -> (B, OUT) f32."""
    B, IN = x.shape
    OUT, IN_w = w.shape
    assert IN == IN_w, (IN, IN_w)
    assert b.shape == (OUT,), (b.shape, OUT)
    # Kernel is specialized to a single output column (nn.Linear(10, 1)).
    # TODO(synk): if OUT ever reaches >=128, switch the batched path to the MXU
    # (jnp.dot with preferred_element_type=f32) instead of the VPU reduce.
    assert OUT == 1, "kernel specialized to nn.Linear(IN, 1); generalize before reuse"

    # Pick the largest clean batch tile for the lane-dense path; fall back to the
    # grid-less single-shot path for small / ragged B (including the literal B=1 case).
    for tb in (1024, 512, 256, 128):
        if B >= tb and B % tb == 0:
            return _linear_batched(x, w, b, tb)
    return _linear_small(x, w, b)


if __name__ == "__main__":
    key = jax.random.PRNGKey(0)
    kx, kw, kb, kx2 = jax.random.split(key, 4)

    IN, OUT = 10, 1

    # Deterministic parameter init (mimicking nn.Linear's uniform(-1/sqrt(IN), 1/sqrt(IN)))
    bound = 1.0 / (IN ** 0.5)
    w = jax.random.uniform(kw, (OUT, IN), jnp.float32, -bound, bound)  # PyTorch layout (OUT, IN)
    b = jax.random.uniform(kb, (OUT,), jnp.float32, -bound, bound)

    # 1) The literal SimpleModel input: x = torch.randn(1, 10)
    x1 = jax.random.normal(kx, (1, IN), jnp.float32)
    y1 = jax.block_until_ready(simple_model_forward(x1, w, b))
    ref1 = x1 @ w.T + b
    assert y1.shape == (1, OUT)
    assert jnp.allclose(y1, ref1, atol=1e-5), (y1, ref1)

    # 2) Exercise the lane-dense batched path from the perf review (grid of 2 tiles).
    B2 = 2048
    x2 = jax.random.normal(kx2, (B2, IN), jnp.float32)
    y2 = jax.block_until_ready(simple_model_forward(x2, w, b))
    ref2 = x2 @ w.T + b
    assert y2.shape == (B2, OUT)
    assert jnp.allclose(y2, ref2, atol=1e-5), (y2, ref2)

    print("KERNEL_OK")
</pallas_src>

<mosaic_0001>
module attributes {stable_mosaic.version = 11 : i64} {
  func.func @_linear_small_kernel(%arg0: memref<1xf32, #tpu.memory_space<smem>>, %arg1: memref<1x10xf32, #tpu.memory_space<vmem>>, %arg2: memref<1x10xf32, #tpu.memory_space<vmem>>, %arg3: memref<1x1xf32, #tpu.memory_space<vmem>>) attributes {dimension_semantics = [], scalar_prefetch = 0 : i64, scratch_operands = 0 : i64, tpu.core_type = #tpu.core_type<tc>} {
    %c0 = arith.constant 0 : index
    %0 = memref.load %arg0[%c0] : memref<1xf32, #tpu.memory_space<smem>>
    %c0_0 = arith.constant 0 : index
    %c0_1 = arith.constant 0 : index
    %1 = vector.load %arg1[%c0_0, %c0_1] : memref<1x10xf32, #tpu.memory_space<vmem>>, vector<1x10xf32>
    %c0_2 = arith.constant 0 : index
    %c0_3 = arith.constant 0 : index
    %2 = vector.load %arg2[%c0_2, %c0_3] : memref<1x10xf32, #tpu.memory_space<vmem>>, vector<1x10xf32>
    %3 = arith.mulf %1, %2 : vector<1x10xf32>
    %cst = arith.constant dense<0.000000e+00> : vector<1xf32>
    %4 = vector.multi_reduction <add>, %3, %cst [1] : vector<1x10xf32> to vector<1xf32>
    %5 = vector.shape_cast %4 : vector<1xf32> to vector<1x1xf32>
    %6 = vector.broadcast %0 : f32 to vector<1x1xf32>
    %7 = arith.addf %5, %6 : vector<1x1xf32>
    %c0_4 = arith.constant 0 : index
    %c0_5 = arith.constant 0 : index
    %8 = vector.load %arg3[%c0_4, %c0_5] : memref<1x1xf32, #tpu.memory_space<vmem>>, vector<1x1xf32>
    tpu.vector_store %arg3[%c0_4, %c0_5], %7 {strides = array<i32>} : memref<1x1xf32, #tpu.memory_space<vmem>>, vector<1x1xf32>,
    return
  }
}

</mosaic_0001>

<bundles_post_ra>
// kernel: tpu_custom_call.1
= control target key start
LH: loop header
LB: loop body
LE: loop exit
PB: predicated region body
PF: predicated region fallthrough
CT: control target
= control target key end

     0   :  { %vm20_vm0 = vcmask 73728   ;;  %s98_s0 = inlined_call_operand.<no memory space> [shape: f32[1], index: 0, kind: input, shape index: {}]   ;;  %s99_s1 = inlined_call_operand.vmem [shape: f32[1,10], index: 1, kind: input, shape index: {}]   ;;  %s100_s2 = inlined_call_operand.vmem [shape: f32[1,10], index: 2, kind: input, shape index: {}]   ;;  %s101_s3 = inlined_call_operand.hbm [shape: f32[1,1], index: 3, kind: output, shape index: {}]  }
   0x1   :  { %v17_v0 = vld [vmem:[%s99_s1] sm:$0x1] }
   0x2   :  { %v18_v1 = vld [vmem:[%s100_s2] sm:$0x1] }
   0x3   :  { %v19_v2 = vmul.f32 %v18_v1, %v17_v0 }
   0x4   :  { %9 = vsyncpa [#allocation4], 0  ;;  %v24_v4 = vstv %s98_s0  ;;  %s65_s18 = smov [#allocation3]   ;;  %vm26_vm1 = vcmask 0  }
   0x5   :  { %v21_v3 = vsel %vm20_vm0, %v19_v2, 0.0  ;;  %s34_s19 = sshll.u32 %s65_s18, 4  ;;  %s35_s19 = int_to_ptr.vmem [resolvable:$true] %s34_s19 }
   0x6   :  { %22 = vadd.xlane.f32.xlu0 %v21_v3  ;;  %s43_s1 = scalar_lea.vmem %s35_s19, 16  ;;  %s47_s20 = scalar_lea.vmem %s35_s19, 32 }
   0x7   :  { %p44_p0 = scmp.ne.s32.totalorder %s35_s19, %s43_s1  ;;  %p48_p1 = scmp.lt.s32.totalorder %s35_s19, %s35_s19 }
   0x8   :  { %p49_p2 = scmp.lt.s32.totalorder %s47_s20, %s43_s1 }
   0xa   :  { %p50_p3 = por %p49_p2, %p48_p1 }
   0xc   :  { %p51_p4 = pnand %p50_p3, %p44_p0 }
  0x8f   :  { %v23_v5 = vpop.xlane.xlu0 %22 }
  0x90   :  { %v25_v6 = vadd.f32 %v24_v4, %v23_v5 }
  0x92   :  { %27 = vst.msk [vmem:[#allocation3] sm:$0x1] %vm26_vm1, %v25_v6 }
  0x93   :  { %54 = shalt.err (!%p51_p4)
}
  0x94   :  { %37 = dma.vmem_to_hbm [thread:$0]  %s35_s19, 16, %s101_s3, [#allocation4]  }
  0x95   :  { %63 = dma.done.wait [#allocation4], 16  }
  0x96   :  { %64 = vsyncadd [#allocation4], 4294967280 }
  0x97   :  { %41 = vsyncpa [#allocation4], 1 }

</bundles_post_ra>
